<compile_context>
chip_gen: v7x
topology: tpu7x:2x2x1
jax: 0.10.0
libtpu: 0.0.40
codegen_flags: <defaults>
</compile_context>

<pallas_src>
import math

import numpy as np
import jax
import jax.numpy as jnp
from jax.experimental import pallas as pl
from jax.experimental.pallas import tpu as pltpu


def _kernel(x_ref, a_ref, b_ref, c_ref, o_ref):
    xf = x_ref[...].astype(jnp.float32)           # (tile_r, KC)
    sig = 0.5 * jnp.tanh(0.5 * xf) + 0.5          # sigmoid via one EUP tanh
    out = a_ref[...] * sig + b_ref[...] * xf + c_ref[...]   # per-lane affine
    o_ref[...] = out.astype(o_ref.dtype)


def _channel_coeffs(C, KC, size_weight, size_bias, shape_weight, shape_bias):
    """Per-lane (a, b, c) rows of shape (1, KC), built host-side with numpy."""
    ch = np.arange(KC) % C
    is_shape = ch >= (C - 2)                      # channels [-2:]
    is_size = (ch >= (C - 5)) & ~is_shape         # channels [-5:-2]
    a = np.where(is_shape, shape_weight, np.where(is_size, size_weight, 0.0))
    b = np.where(is_shape | is_size, 0.0, 1.0)
    c = np.where(is_shape, shape_bias, np.where(is_size, size_bias, 0.0))
    row = lambda v: jnp.asarray(v.reshape(1, KC), dtype=jnp.float32)
    return row(a), row(b), row(c)


def superquadric_constraints(x,
                             size_weight=1.0,
                             size_bias=0.001,
                             shape_weight=1.0,
                             shape_bias=0.19,
                             max_tile_rows=1024):
    """x: [B, C] float array, C >= 5. Returns transformed array (same shape/dtype)."""
    B, C = x.shape
    assert C >= 5, "superquadric_constraints needs at least 5 channels"
    dtype = x.dtype

    # Fold K batch rows into one lane-dense slab row of width K*C (mult. of 128).
    K = 128 // math.gcd(C, 128)
    KC = K * C
    B_pad = ((B + K - 1) // K) * K
    xp = x if B_pad == B else jnp.pad(x, ((0, B_pad - B), (0, 0)))
    R = B_pad // K
    slab = xp.reshape(R, KC)

    a, b, c = _channel_coeffs(C, KC, size_weight, size_bias,
                              shape_weight, shape_bias)

    # Row tile: multiple of 8, ~2 MiB per buffer (~8 MiB double-buffered in+out),
    # comfortably under the scoped-VMEM default on every generation (incl. v7x).
    itemsize = jnp.dtype(dtype).itemsize
    budget_rows = max(8, (2 * 1024 * 1024) // (KC * max(itemsize, 4)))
    budget_rows = max(8, (min(int(max_tile_rows), budget_rows) // 8) * 8)
    tile_r = R if R <= budget_rows else budget_rows
    grid = (pl.cdiv(R, tile_r),)

    out_slab = pl.pallas_call(
        _kernel,
        out_shape=jax.ShapeDtypeStruct((R, KC), dtype),
        grid=grid,
        in_specs=[
            pl.BlockSpec((tile_r, KC), lambda i: (i, 0)),   # x slab (tiled over rows)
            pl.BlockSpec((1, KC), lambda i: (0, 0)),        # a
            pl.BlockSpec((1, KC), lambda i: (0, 0)),        # b
            pl.BlockSpec((1, KC), lambda i: (0, 0)),        # c
        ],
        out_specs=pl.BlockSpec((tile_r, KC), lambda i: (i, 0)),
        input_output_aliases={0: 0},   # in-place, like the PyTorch module
        compiler_params=pltpu.CompilerParams(
            dimension_semantics=("parallel",)),
    )(slab, a, b, c)

    out = out_slab.reshape(B_pad, C)
    if B_pad != B:
        out = out[:B]
    return out


def _reference(x, size_weight=1.0, size_bias=0.001,
               shape_weight=1.0, shape_bias=0.19):
    xf = x.astype(jnp.float32)
    sig = jax.nn.sigmoid(xf)
    y = xf
    y = y.at[:, -5:-2].set(size_weight * sig[:, -5:-2] + size_bias)
    y = y.at[:, -2:].set(shape_weight * sig[:, -2:] + shape_bias)
    return y.astype(x.dtype)


if __name__ == "__main__":
    k1, k2, k3 = jax.random.split(jax.random.PRNGKey(0), 3)

    fn = jax.jit(lambda t: superquadric_constraints(t))
    fn_small_tiles = jax.jit(lambda t: superquadric_constraints(t, max_tile_rows=8))

    # 1) small, exactly lane-foldable case (B*C multiple of 128, single block)
    x1 = jax.random.normal(k1, (8, 32), dtype=jnp.float32)
    o1 = jax.block_until_ready(fn(x1))
    assert jnp.allclose(o1, _reference(x1), atol=1e-5, rtol=1e-5), "mismatch (case 1)"

    # 2) awkward case: C not a power of two, B needs row padding
    x2 = jax.random.normal(k2, (7, 11), dtype=jnp.float32)
    o2 = jax.block_until_ready(fn(x2))
    assert jnp.allclose(o2, _reference(x2), atol=1e-5, rtol=1e-5), "mismatch (case 2)"

    # 3) multi-block grid with a partial last block (exercises the pipeline path)
    x3 = jax.random.normal(k3, (80, 32), dtype=jnp.float32)
    o3 = jax.block_until_ready(fn_small_tiles(x3))
    assert jnp.allclose(o3, _reference(x3), atol=1e-5, rtol=1e-5), "mismatch (case 3)"

    print("KERNEL_OK")
</pallas_src>

<mosaic_0001>
module attributes {stable_mosaic.version = 11 : i64} {
  func.func @_kernel(%arg0: i32, %arg1: memref<2x128xf32, #tpu.memory_space<vmem>>, %arg2: memref<1x128xf32, #tpu.memory_space<vmem>>, %arg3: memref<1x128xf32, #tpu.memory_space<vmem>>, %arg4: memref<1x128xf32, #tpu.memory_space<vmem>>, %arg5: memref<2x128xf32, #tpu.memory_space<vmem>>) attributes {dimension_semantics = [#tpu.dimension_semantics<parallel>], iteration_bounds = array<i64: 1>, scalar_prefetch = 0 : i64, scratch_operands = 0 : i64, tpu.core_type = #tpu.core_type<tc>, window_params = [{transform_indices = @transform_0, window_bounds = array<i64: 2, 128>}, {pipeline_mode = #tpu.pipeline_mode<synchronous>, transform_indices = @transform_1, window_bounds = array<i64: 1, 128>}, {pipeline_mode = #tpu.pipeline_mode<synchronous>, transform_indices = @transform_2, window_bounds = array<i64: 1, 128>}, {pipeline_mode = #tpu.pipeline_mode<synchronous>, transform_indices = @transform_3, window_bounds = array<i64: 1, 128>}, {transform_indices = @transform_4, window_bounds = array<i64: 2, 128>}]} {
    %c0 = arith.constant 0 : index
    %c0_0 = arith.constant 0 : index
    %0 = vector.load %arg1[%c0, %c0_0] : memref<2x128xf32, #tpu.memory_space<vmem>>, vector<2x128xf32>
    %cst = arith.constant 5.000000e-01 : f32
    %1 = vector.broadcast %cst : f32 to vector<2x128xf32>
    %2 = arith.mulf %1, %0 : vector<2x128xf32>
    %3 = math.tanh %2 : vector<2x128xf32>
    %cst_1 = arith.constant 5.000000e-01 : f32
    %4 = vector.broadcast %cst_1 : f32 to vector<2x128xf32>
    %5 = arith.mulf %4, %3 : vector<2x128xf32>
    %cst_2 = arith.constant 5.000000e-01 : f32
    %6 = vector.broadcast %cst_2 : f32 to vector<2x128xf32>
    %7 = arith.addf %5, %6 : vector<2x128xf32>
    %c0_3 = arith.constant 0 : index
    %c0_4 = arith.constant 0 : index
    %8 = vector.load %arg2[%c0_3, %c0_4] : memref<1x128xf32, #tpu.memory_space<vmem>>, vector<1x128xf32>
    %9 = vector.broadcast %8 : vector<1x128xf32> to vector<2x128xf32>
    %10 = arith.mulf %9, %7 : vector<2x128xf32>
    %c0_5 = arith.constant 0 : index
    %c0_6 = arith.constant 0 : index
    %11 = vector.load %arg3[%c0_5, %c0_6] : memref<1x128xf32, #tpu.memory_space<vmem>>, vector<1x128xf32>
    %12 = vector.broadcast %11 : vector<1x128xf32> to vector<2x128xf32>
    %13 = arith.mulf %12, %0 : vector<2x128xf32>
    %14 = arith.addf %10, %13 : vector<2x128xf32>
    %c0_7 = arith.constant 0 : index
    %c0_8 = arith.constant 0 : index
    %15 = vector.load %arg4[%c0_7, %c0_8] : memref<1x128xf32, #tpu.memory_space<vmem>>, vector<1x128xf32>
    %16 = vector.broadcast %15 : vector<1x128xf32> to vector<2x128xf32>
    %17 = arith.addf %14, %16 : vector<2x128xf32>
    %c0_9 = arith.constant 0 : index
    %c0_10 = arith.constant 0 : index
    %18 = vector.load %arg5[%c0_9, %c0_10] : memref<2x128xf32, #tpu.memory_space<vmem>>, vector<2x128xf32>
    tpu.vector_store %arg5[%c0_9, %c0_10], %17 {strides = array<i32>} : memref<2x128xf32, #tpu.memory_space<vmem>>, vector<2x128xf32>,
    return
  }
  func.func @transform_0(%arg0: i32) -> (i32, i32) {
    %c0_i32 = arith.constant 0 : i32
    %c0_i32_0 = arith.constant 0 : i32
    return %arg0, %c0_i32 : i32, i32
  }
  func.func @transform_1(%arg0: i32) -> (i32, i32) {
    %c0_i32 = arith.constant 0 : i32
    %c0_i32_0 = arith.constant 0 : i32
    %c0_i32_1 = arith.constant 0 : i32
    return %c0_i32, %c0_i32_0 : i32, i32
  }
  func.func @transform_2(%arg0: i32) -> (i32, i32) {
    %c0_i32 = arith.constant 0 : i32
    %c0_i32_0 = arith.constant 0 : i32
    %c0_i32_1 = arith.constant 0 : i32
    return %c0_i32, %c0_i32_0 : i32, i32
  }
  func.func @transform_3(%arg0: i32) -> (i32, i32) {
    %c0_i32 = arith.constant 0 : i32
    %c0_i32_0 = arith.constant 0 : i32
    %c0_i32_1 = arith.constant 0 : i32
    return %c0_i32, %c0_i32_0 : i32, i32
  }
  func.func @transform_4(%arg0: i32) -> (i32, i32) {
    %c0_i32 = arith.constant 0 : i32
    %c0_i32_0 = arith.constant 0 : i32
    return %arg0, %c0_i32 : i32, i32
  }
}

</mosaic_0001>

<bundles_post_ra>
// kernel: _lambda_.1
= control target key start
LH: loop header
LB: loop body
LE: loop exit
PB: predicated region body
PF: predicated region fallthrough
CT: control target
= control target key end

     0   :  { %s97_s0 = inlined_call_operand.vmem [shape: f32[2,128], index: 0, kind: input, shape index: {}, may-alias: {0,4}]   ;;  %s98_s2 = inlined_call_operand.vmem [shape: f32[1,128], index: 2, kind: input, shape index: {}]   ;;  %s99_s1 = inlined_call_operand.vmem [shape: f32[1,128], index: 1, kind: input, shape index: {}]   ;;  %s100_s3 = inlined_call_operand.vmem [shape: f32[1,128], index: 3, kind: input, shape index: {}]   ;;  %s101_s4 = inlined_call_operand.vmem [shape: f32[2,128], index: 4, kind: output, shape index: {}, may-alias: {0,4}]  }
   0x1   :  { %v17_v0 = vld [vmem:[%s97_s0] sm:$0x3] }
   0x2   :  { %v18_v1 = vmul.f32 0.5, %v17_v0  ;;  %v53_v3 = vld [vmem:[%s98_s2] ss:$0 sm:$0xff] }
   0x3   :  { %v52_v5 = vld [vmem:[%s99_s1] ss:$0 sm:$0xff]  ;;  %v37_v7 = vmul.f32 %v53_v3, %v17_v0 }
   0x4   :  { %55 = vtanh.f32 %v18_v1  ;;  %v54_v9 = vld [vmem:[%s100_s3] ss:$0 sm:$0xff] }
   0xe   :  { %v56_v2 = vpop.eup %55 }
   0xf   :  { %v20_v4 = vmul.f32 0.5, %v56_v2 }
  0x11   :  { %v21_v6 = vadd.f32 0.5, %v20_v4 }
  0x13   :  { %v29_v8 = vmul.f32 %v52_v5, %v21_v6 }
  0x15   :  { %v38_v10 = vadd.f32 %v37_v7, %v29_v8 }
  0x17   :  { %v46_v11 = vadd.f32 %v54_v9, %v38_v10 }
  0x19   :  { %47 = vst [vmem:[%s101_s4] sm:$0x3] %v46_v11 }

</bundles_post_ra>
